<compile_context>
chip_gen: v5e
topology: v5e:2x2
jax: 0.10.0
libtpu: 0.0.40
codegen_flags: <defaults>
</compile_context>

<pallas_src>
import functools
import math

import jax
import jax.numpy as jnp
from jax.experimental import pallas as pl
from jax.experimental.pallas import tpu as pltpu

_EPS = 1e-6


def _round_up(x, m):
    return ((x + m - 1) // m) * m


def _sublane_multiple(dtype):
    # 8 rows for 4-byte dtypes, 16 for bf16, 32 for int8/fp8.
    return max(8, 32 // jnp.dtype(dtype).itemsize)


def _vmem_budget():
    """Returns (vmem_limit_bytes for CompilerParams, per-grid-step budget)."""
    try:
        phys = int(pltpu.get_tpu_info().vmem_capacity_bytes)
    except Exception:
        phys = 0
    if phys <= 0:
        phys = 64 * 1024 * 1024                    # conservative: v7x per-core VMEM
    limit = min(phys // 2, 64 * 1024 * 1024)       # 64 MiB on v5e/v6e, 32 MiB on v7x
    limit = max(limit, 32 * 1024 * 1024)
    # Budget roughly 1/3 of the scoped limit per grid step (in/out double
    # buffers + f32 temp), leaving headroom for pipeline internals.
    return limit, limit // 3


def _pick_bn(n, per_sample_foot, per_sample_io, budget,
             target_step_io=4 * 1024 * 1024):
    """Samples per fused grid step: a divisor of N that fits the VMEM budget,
    keeps >= 2 grid steps when possible (v7x megacore + pipelining), and moves
    a few MiB per step to amortise the ~0.35us per-step overhead."""
    divisors = [d for d in range(1, n + 1) if n % d == 0]
    feasible = [d for d in divisors if d * per_sample_foot <= budget]
    if not feasible:
        return 1
    cand = [d for d in feasible if n // d >= 2] or feasible
    good = [d for d in cand if d * per_sample_io >= target_step_io]
    return min(good) if good else max(cand)


# ---------------------------------------------------------------------------
# Pallas kernels
# ---------------------------------------------------------------------------
def _grn_fused_kernel(gamma_ref, beta_ref, x_ref, o_ref, *, fold, chans):
    """Single-pass GRN for `bn` whole samples resident in VMEM.

    gamma_ref/beta_ref: (1, CL) lane-folded parameters, CL = fold * chans,
                        param_l[j] == param[j % chans].
    x_ref / o_ref     : (bn, Mf, CL) with Mf = H*W/fold.
    """
    x = x_ref[...].astype(jnp.float32)                     # (bn, Mf, CL)
    ssq = jnp.sum(x * x, axis=1)                           # (bn, CL) per-lane sums
    # Per-channel totals, already expanded to every lane of that channel:
    #   total[j] = sum_i ssq[(j - i*chans) mod CL]   (exact f32 adds, XLU rolls)
    total = ssq
    for i in range(1, fold):
        total = total + pltpu.roll(ssq, i * chans, 1)
    gx = jnp.sqrt(total)                                   # (bn, CL): Gx[j % C]
    # mean over all CL lanes of Gx[j % C] == mean over the C channels of Gx.
    nx = gx / (jnp.mean(gx, axis=-1, keepdims=True) + _EPS)
    mult = 1.0 + gamma_ref[...] * nx                       # (bn, CL)
    o_ref[...] = (x_ref[...].astype(jnp.float32) * mult[:, None, :]
                  + beta_ref[...]).astype(o_ref.dtype)


def _grn_sumsq_kernel(x_ref, ssq_ref, *, rows_total, tile_rows, mask_tail):
    # Pass 1: accumulate sum of x^2 over spatial tiles per (sample, lane).
    t = pl.program_id(1)

    @pl.when(t == 0)
    def _init():
        ssq_ref[...] = jnp.zeros_like(ssq_ref)

    x = x_ref[...].astype(jnp.float32)                     # (1, tm, CL)
    if mask_tail:
        # Last tile may extend past the array; OOB reads are garbage -> mask.
        rows = jax.lax.broadcasted_iota(jnp.int32, x.shape, 1)
        x = jnp.where(rows < rows_total - t * tile_rows, x, 0.0)
    ssq_ref[...] += jnp.sum(x * x, axis=1, keepdims=True)  # (1, 1, CL)


def _grn_apply_kernel(mult_ref, beta_ref, x_ref, o_ref):
    # Pass 2: pure streaming FMA (norm math hoisted out of the kernel).
    # OOB tail reads/writes are handled by the pipeline (writes are masked).
    o_ref[...] = (x_ref[...].astype(jnp.float32) * mult_ref[...]
                  + beta_ref[...]).astype(o_ref.dtype)


# ---------------------------------------------------------------------------
# Wrapper
# ---------------------------------------------------------------------------
def grn_forward(x, gamma, beta, *, tile_m=None, single_pass=None):
    """GRN forward.  x: (N, H, W, C); gamma/beta: C elements each.

    tile_m:      optional row-tile override (in folded rows) for the two-pass
                 path (used for testing).
    single_pass: force (True) / forbid (False) the fused single-pass path.
    """
    N, H, W, C = x.shape
    M = H * W
    in_item = x.dtype.itemsize
    sub = _sublane_multiple(x.dtype)

    # ---- lane folding: make the minor (lane) dim a multiple of 128 ---------
    f = 1
    if C % 128 != 0:
        cand = 128 // math.gcd(C, 128)
        if M % cand == 0:
            f = cand
    Mf, CL = M // f, f * C

    xf = x.reshape(N, Mf, CL)                      # free, contiguous reshape

    gamma_c = gamma.reshape(1, C).astype(jnp.float32)
    beta_c = beta.reshape(1, C).astype(jnp.float32)
    gamma_l = jnp.tile(gamma_c, (1, f))            # (1, CL): gamma_l[j]=gamma[j%C]
    beta_l = jnp.tile(beta_c, (1, f))              # (1, CL)

    vmem_limit, budget = _vmem_budget()

    def cparams(sem):
        return pltpu.CompilerParams(dimension_semantics=sem,
                                    vmem_limit_bytes=int(vmem_limit))

    # Footprint of one sample inside a fused grid step:
    #   double-buffered input + double-buffered output + one f32 temp slab.
    per_sample_foot = Mf * CL * (4 * in_item + 4)
    per_sample_io = Mf * CL * 2 * in_item          # HBM bytes moved per sample

    if single_pass is None:
        # N >= 2 keeps >= 2 parallel grid steps (v7x has 2 TensorCores and a
        # 1-step grid also degenerates the software pipeline).
        use_fused = (N >= 2) and (per_sample_foot <= budget)
    else:
        use_fused = bool(single_pass)

    if use_fused:
        bn = _pick_bn(N, per_sample_foot, per_sample_io, budget)
        kernel = functools.partial(_grn_fused_kernel, fold=f, chans=C)
        out = pl.pallas_call(
            kernel,
            out_shape=jax.ShapeDtypeStruct((N, Mf, CL), x.dtype),
            grid=(N // bn,),
            in_specs=[
                pl.BlockSpec((1, CL), lambda n: (0, 0)),          # gamma (folded)
                pl.BlockSpec((1, CL), lambda n: (0, 0)),          # beta  (folded)
                pl.BlockSpec((bn, Mf, CL), lambda n: (n, 0, 0)),  # x
            ],
            out_specs=pl.BlockSpec((bn, Mf, CL), lambda n: (n, 0, 0)),
            compiler_params=cparams(("parallel",)),
        )(gamma_l, beta_l, xf)
        return out.reshape(N, H, W, C)

    # ------------------------------ two-pass --------------------------------
    if tile_m is not None:
        tm = max(sub, _round_up(int(tile_m), sub))
    else:
        # Byte-sized tiles (~4 MiB moved per step), bounded by the VMEM budget
        # with double-buffered in + out and an f32 temp.
        target_tile_bytes = 4 * 1024 * 1024
        per_row_foot = CL * (4 * in_item + 4)
        tm_budget = max(sub, (budget // per_row_foot) // sub * sub)
        tm_target = max(sub, (target_tile_bytes // (CL * in_item)) // sub * sub)
        tm = min(tm_budget, tm_target)
    tm = min(tm, _round_up(Mf, sub))
    T = pl.cdiv(Mf, tm)
    mask_tail = (Mf % tm) != 0

    # pass 1: per-(sample, lane) sum of squares; reduction axis last.
    ssq_fold = pl.pallas_call(
        functools.partial(_grn_sumsq_kernel, rows_total=Mf, tile_rows=tm,
                          mask_tail=mask_tail),
        out_shape=jax.ShapeDtypeStruct((N, 1, CL), jnp.float32),
        grid=(N, T),
        in_specs=[pl.BlockSpec((1, tm, CL), lambda n, t: (n, t, 0))],
        out_specs=pl.BlockSpec((1, 1, CL), lambda n, t: (n, 0, 0)),
        compiler_params=cparams(("parallel", "arbitrary")),
    )(xf)

    # Tiny per-(N, C) normalisation math hoisted out of the apply kernel.
    ssq_c = ssq_fold.reshape(N, f, C).sum(axis=1)                  # (N, C)
    gx = jnp.sqrt(ssq_c)
    nx = gx / (jnp.mean(gx, axis=-1, keepdims=True) + _EPS)
    mult_l = jnp.tile(1.0 + gamma_c * nx, (1, f)).reshape(N, 1, CL)
    beta_l3 = beta_l.reshape(1, 1, CL)

    # pass 2: pure streaming FMA; fully parallel grid (megacore on v7x).
    out = pl.pallas_call(
        _grn_apply_kernel,
        out_shape=jax.ShapeDtypeStruct((N, Mf, CL), x.dtype),
        grid=(N, T),
        in_specs=[
            pl.BlockSpec((1, 1, CL), lambda n, t: (n, 0, 0)),      # mult
            pl.BlockSpec((1, 1, CL), lambda n, t: (0, 0, 0)),      # beta
            pl.BlockSpec((1, tm, CL), lambda n, t: (n, t, 0)),     # x
        ],
        out_specs=pl.BlockSpec((1, tm, CL), lambda n, t: (n, t, 0)),
        compiler_params=cparams(("parallel", "parallel")),
    )(mult_l, beta_l3, xf)

    return out.reshape(N, H, W, C)


# ---------------------------------------------------------------------------
# Pure-JAX reference (mirror of the PyTorch GRN.forward)
# ---------------------------------------------------------------------------
def grn_reference(x, gamma, beta):
    gx = jnp.sqrt(jnp.sum(jnp.square(x), axis=(1, 2), keepdims=True))
    nx = gx / (jnp.mean(gx, axis=-1, keepdims=True) + _EPS)
    g = gamma.reshape(1, 1, 1, -1)
    b = beta.reshape(1, 1, 1, -1)
    return g * (x * nx) + b + x


if __name__ == "__main__":
    key = jax.random.PRNGKey(0)
    kx, kg, kb, kx2 = jax.random.split(key, 4)

    # Case 1: C=32 (not a multiple of 128) -> lane folding f=4, fused single
    # pass, grid of 2 parallel steps.
    N, H, W, C = 2, 16, 16, 32
    x = jax.random.normal(kx, (N, H, W, C), jnp.float32)
    # zeros (as in nn.Parameter init) would make GRN an exact identity; use
    # small random values so the normalization path is exercised.
    gamma = 0.5 * jax.random.normal(kg, (C,), jnp.float32)
    beta = 0.1 * jax.random.normal(kb, (C,), jnp.float32)
    ref = grn_reference(x, gamma, beta)

    fused = jax.jit(grn_forward)(x, gamma, beta)
    jax.block_until_ready(fused)
    assert fused.shape == (N, H, W, C), fused.shape
    assert jnp.allclose(fused, ref, rtol=2e-5, atol=1e-4), \
        float(jnp.max(jnp.abs(fused - ref)))

    # Case 2: forced two-pass path with a small tile that does NOT divide the
    # folded spatial extent (exercises accumulator init, in-kernel tail
    # masking, and the hoisted pure-FMA apply pass) -- no padding/slicing.
    tiled_fn = jax.jit(
        functools.partial(grn_forward, tile_m=24, single_pass=False))
    tiled = tiled_fn(x, gamma, beta)
    jax.block_until_ready(tiled)
    assert jnp.allclose(tiled, ref, rtol=2e-5, atol=1e-4), \
        float(jnp.max(jnp.abs(tiled - ref)))

    # Case 3: C already a multiple of 128 -> no folding, fused path.
    N2, H2, W2, C2 = 2, 8, 8, 128
    x2 = jax.random.normal(kx2, (N2, H2, W2, C2), jnp.float32)
    g2 = 0.3 * jnp.sin(jnp.arange(C2, dtype=jnp.float32))
    b2 = 0.05 * jnp.cos(jnp.arange(C2, dtype=jnp.float32))
    ref2 = grn_reference(x2, g2, b2)
    out2 = jax.jit(grn_forward)(x2, g2, b2)
    jax.block_until_ready(out2)
    assert jnp.allclose(out2, ref2, rtol=2e-5, atol=1e-4), \
        float(jnp.max(jnp.abs(out2 - ref2)))

    print("KERNEL_OK")
</pallas_src>

<mosaic_0001>
module attributes {stable_mosaic.version = 11 : i64} {
  func.func @_grn_fused_kernel(%arg0: i32, %arg1: memref<1x128xf32, #tpu.memory_space<vmem>>, %arg2: memref<1x128xf32, #tpu.memory_space<vmem>>, %arg3: memref<1x64x128xf32, #tpu.memory_space<vmem>>, %arg4: memref<1x64x128xf32, #tpu.memory_space<vmem>>) attributes {dimension_semantics = [#tpu.dimension_semantics<parallel>], iteration_bounds = array<i64: 2>, scalar_prefetch = 0 : i64, scratch_operands = 0 : i64, tpu.core_type = #tpu.core_type<tc>, window_params = [{pipeline_mode = #tpu.pipeline_mode<synchronous>, transform_indices = @transform_0, window_bounds = array<i64: 1, 128>}, {pipeline_mode = #tpu.pipeline_mode<synchronous>, transform_indices = @transform_1, window_bounds = array<i64: 1, 128>}, {transform_indices = @transform_2, window_bounds = array<i64: 1, 64, 128>}, {transform_indices = @transform_3, window_bounds = array<i64: 1, 64, 128>}]} {
    %c0 = arith.constant 0 : index
    %c0_0 = arith.constant 0 : index
    %c0_1 = arith.constant 0 : index
    %0 = vector.load %arg3[%c0, %c0_0, %c0_1] : memref<1x64x128xf32, #tpu.memory_space<vmem>>, vector<1x64x128xf32>
    %1 = arith.mulf %0, %0 : vector<1x64x128xf32>
    %cst = arith.constant dense<0.000000e+00> : vector<1x128xf32>
    %2 = vector.multi_reduction <add>, %1, %cst [1] : vector<1x64x128xf32> to vector<1x128xf32>
    %c32_i32 = arith.constant 32 : i32
    %3 = tpu.dynamic_rotate %2 by %c32_i32 dim 1 : vector<1x128xf32>, i32 -> vector<1x128xf32>
    %4 = arith.addf %2, %3 : vector<1x128xf32>
    %c64_i32 = arith.constant 64 : i32
    %5 = tpu.dynamic_rotate %2 by %c64_i32 dim 1 : vector<1x128xf32>, i32 -> vector<1x128xf32>
    %6 = arith.addf %4, %5 : vector<1x128xf32>
    %c96_i32 = arith.constant 96 : i32
    %7 = tpu.dynamic_rotate %2 by %c96_i32 dim 1 : vector<1x128xf32>, i32 -> vector<1x128xf32>
    %8 = arith.addf %6, %7 : vector<1x128xf32>
    %9 = math.sqrt %8 : vector<1x128xf32>
    %cst_2 = arith.constant dense<0.000000e+00> : vector<1xf32>
    %10 = vector.multi_reduction <add>, %9, %cst_2 [1] : vector<1x128xf32> to vector<1xf32>
    %11 = vector.shape_cast %10 : vector<1xf32> to vector<1x1xf32>
    %cst_3 = arith.constant 1.280000e+02 : f32
    %12 = vector.broadcast %cst_3 : f32 to vector<1x1xf32>
    %13 = arith.divf %11, %12 : vector<1x1xf32>
    %cst_4 = arith.constant 9.99999997E-7 : f32
    %14 = vector.broadcast %cst_4 : f32 to vector<1x1xf32>
    %15 = arith.addf %13, %14 : vector<1x1xf32>
    %16 = vector.broadcast %15 : vector<1x1xf32> to vector<1x128xf32>
    %17 = arith.divf %9, %16 : vector<1x128xf32>
    %c0_5 = arith.constant 0 : index
    %c0_6 = arith.constant 0 : index
    %18 = vector.load %arg1[%c0_5, %c0_6] : memref<1x128xf32, #tpu.memory_space<vmem>>, vector<1x128xf32>
    %19 = arith.mulf %18, %17 : vector<1x128xf32>
    %cst_7 = arith.constant 1.000000e+00 : f32
    %20 = vector.broadcast %cst_7 : f32 to vector<1x128xf32>
    %21 = arith.addf %20, %19 : vector<1x128xf32>
    %c0_8 = arith.constant 0 : index
    %c0_9 = arith.constant 0 : index
    %c0_10 = arith.constant 0 : index
    %22 = vector.load %arg3[%c0_8, %c0_9, %c0_10] : memref<1x64x128xf32, #tpu.memory_space<vmem>>, vector<1x64x128xf32>
    %23 = vector.shape_cast %21 : vector<1x128xf32> to vector<1x1x128xf32>
    %24 = vector.broadcast %23 : vector<1x1x128xf32> to vector<1x64x128xf32>
    %25 = arith.mulf %22, %24 : vector<1x64x128xf32>
    %c0_11 = arith.constant 0 : index
    %c0_12 = arith.constant 0 : index
    %26 = vector.load %arg2[%c0_11, %c0_12] : memref<1x128xf32, #tpu.memory_space<vmem>>, vector<1x128xf32>
    %27 = vector.shape_cast %26 : vector<1x128xf32> to vector<1x1x128xf32>
    %28 = vector.broadcast %27 : vector<1x1x128xf32> to vector<1x64x128xf32>
    %29 = arith.addf %25, %28 : vector<1x64x128xf32>
    %c0_13 = arith.constant 0 : index
    %c0_14 = arith.constant 0 : index
    %c0_15 = arith.constant 0 : index
    %30 = vector.load %arg4[%c0_13, %c0_14, %c0_15] : memref<1x64x128xf32, #tpu.memory_space<vmem>>, vector<1x64x128xf32>
    tpu.vector_store %arg4[%c0_13, %c0_14, %c0_15], %29 {strides = array<i32>} : memref<1x64x128xf32, #tpu.memory_space<vmem>>, vector<1x64x128xf32>,
    return
  }
  func.func @transform_0(%arg0: i32) -> (i32, i32) {
    %c0_i32 = arith.constant 0 : i32
    %c0_i32_0 = arith.constant 0 : i32
    %c0_i32_1 = arith.constant 0 : i32
    return %c0_i32, %c0_i32_0 : i32, i32
  }
  func.func @transform_1(%arg0: i32) -> (i32, i32) {
    %c0_i32 = arith.constant 0 : i32
    %c0_i32_0 = arith.constant 0 : i32
    %c0_i32_1 = arith.constant 0 : i32
    return %c0_i32, %c0_i32_0 : i32, i32
  }
  func.func @transform_2(%arg0: i32) -> (i32, i32, i32) {
    %c0_i32 = arith.constant 0 : i32
    %c0_i32_0 = arith.constant 0 : i32
    %c0_i32_1 = arith.constant 0 : i32
    return %arg0, %c0_i32, %c0_i32_0 : i32, i32, i32
  }
  func.func @transform_3(%arg0: i32) -> (i32, i32, i32) {
    %c0_i32 = arith.constant 0 : i32
    %c0_i32_0 = arith.constant 0 : i32
    %c0_i32_1 = arith.constant 0 : i32
    return %arg0, %c0_i32, %c0_i32_0 : i32, i32, i32
  }
}

</mosaic_0001>

<bundles_post_ra>
// kernel: grn_forward.1
= control target key start
LH: loop header
LB: loop body
LE: loop exit
PB: predicated region body
PF: predicated region fallthrough
CT: control target
= control target key end

     0   :  { %s402_s12 = smov 0   ;;  %s472_s0 = inlined_call_operand.vmem [shape: f32[1,128], index: 0, kind: input, shape index: {}]   ;;  %s473_s1 = inlined_call_operand.vmem [shape: f32[1,128], index: 1, kind: input, shape index: {}]   ;;  %s474_s2 = inlined_call_operand.vmem [shape: f32[2,64,128], index: 2, kind: input, shape index: {}]   ;;  %s475_s3 = inlined_call_operand.vmem [shape: f32[2,64,128], index: 3, kind: output, shape index: {}]  }
   0x1 LB: > { %s338_s13 = sadd.s32 4294967295, %s376_s12   ;;  %p342_p0 = scmp.ge.s32.totalorder %s376_s12, 1  ;;  %s376_s12 = sphi %s402_s12, %s13_s12  }
   0x2   : > { %p137_p1 = scmp.lt.s32.totalorder %s376_s12, 3 }
   0x4   : > { %p138_p2 = pnand %p342_p0, %p137_p1 }
   0x5   : > { %p161_p3 = scmp.lt.s32.totalorder (!%p138_p2), %s338_s13, 1  ;;  %s378_s18 = smov (!%p138_p2), 32  }
   0x6   : > { %141 = sbr.rel (%p138_p2) target bundleno = 349 (0x15d), region = 32  ;;  %s379_s19 = smov (!%p138_p2), 96  }
   0x7   : > { %s380_s20 = smov (!%p138_p2), 64  }
   0xb   : > { %s477_s13 = smov (!%p161_p3, %s338_s13), 1  ;;  %vm221_vm1 = vcmask 1040384   ;;  %v381_v46 = vmov 128.0  }
   0xc   : > { %s349_s14 = sshll.u32 %s477_s13, 6 }
   0xd   : > { %s165_s17 = scalar_lea.vmem %s474_s2, %s349_s14  ;;  %s170_s27 = scalar_lea.vmem %s475_s3, %s349_s14 }
   0xe   : > { %v418_v0 = vld [vmem:[%s165_s17] sm:$0xff]  ;;  %v420_v1 = vld [vmem:[%s165_s17 + $0x8] sm:$0xff]  ;;  %v422_v2 = vld [vmem:[%s165_s17 + $0x10] sm:$0xff] }
   0xf   : > { %v424_v3 = vld [vmem:[%s165_s17 + $0x18] sm:$0xff]  ;;  %v179_v4 = vmul.f32 %v418_v0, %v418_v0  ;;  %v180_v5 = vmul.f32 %v420_v1, %v420_v1  ;;  %v181_v6 = vmul.f32 %v422_v2, %v422_v2  ;;  %v432_v7 = vld [vmem:[%s165_s17 + $0x20] sm:$0xff]  ;;  %v436_v10 = vld [vmem:[%s165_s17 + $0x28] sm:$0xff] }
  0x10   : > { %v182_v8 = vmul.f32 %v424_v3, %v424_v3  ;;  %v183_v11 = vmul.f32 %v432_v7, %v432_v7  ;;  %v440_v13 = vld [vmem:[%s165_s17 + $0x30] sm:$0xff]  ;;  %v184_v14 = vmul.f32 %v436_v10, %v436_v10  ;;  %v444_v16 = vld [vmem:[%s165_s17 + $0x38] sm:$0xff] }
  0x11   : > { %v187_v9 = vadd.f32 %v180_v5, %v179_v4  ;;  %v185_v17 = vmul.f32 %v440_v13, %v440_v13  ;;  %v186_v19 = vmul.f32 %v444_v16, %v444_v16  ;;  %v249_v5 = vld [vmem:[%s472_s0] sm:$0x1] }
  0x13   : > { %v188_v12 = vadd.f32 %v187_v9, %v181_v6 }
  0x15   : > { %v189_v15 = vadd.f32 %v188_v12, %v182_v8  ;;  %v363_v12 = vld [vmem:[%s473_s1] ss:$0 sm:$0xff] }
  0x17   : > { %v190_v18 = vadd.f32 %v189_v15, %v183_v11 }
  0x19   : > { %v191_v20 = vadd.f32 %v190_v18, %v184_v14 }
  0x1b   : > { %v192_v21 = vadd.f32 %v191_v20, %v185_v17 }
  0x1d   : > { %v193_v22 = vadd.f32 %v192_v21, %v186_v19 }
  0x1f   : > { %v194_v23 = vrot.slane %v193_v22, 4 }
  0x21   : > { %v195_v24 = vadd.f32 %v194_v23, %v193_v22 }
  0x23   : > { %v196_v25 = vrot.slane %v195_v24, 2 }
  0x25   : > { %v197_v26 = vadd.f32 %v196_v25, %v195_v24 }
  0x27   : > { %v198_v27 = vrot.slane %v197_v26, 1 }
  0x29   : > { %v199_v28 = vadd.f32 %v198_v27, %v197_v26 }
  0x2b   : > { %200 = vrot.lane.b32.xlu0 %v199_v28, %s378_s18  ;;  %206 = vrot.lane.b32.xlu1 %v199_v28, %s379_s19 }
  0x33   : > { %203 = vrot.lane.b32.xlu0 %v199_v28, %s380_s20 }
  0x9d   : > { %v201_v29 = vpop.permute.xlu0 %200  ;;  %v207_v32 = vpop.permute.xlu1 %206 }
  0x9e   : > { %v202_v30 = vadd.f32 %v201_v29, %v199_v28 }
  0xa5   : > { %v204_v31 = vpop.permute.xlu0 %203 }
  0xa6   : > { %v205_v33 = vadd.f32 %v204_v31, %v202_v30 }
  0xa8   : > { %v208_v34 = vadd.f32 %v207_v32, %v205_v33 }
  0xaa   : > { %364 = vrsqrt.f32 %v208_v34  ;;  %vm216_vm0 = vcmp.eq.f32.partialorder %v208_v34, inf  ;;  %v219_v42 = vand.u32 2147483648, %v208_v34  ;;  %vm218_vm2 = vcmp.eq.f32.partialorder %v208_v34, 0.0 }
  0xab   : > { %366 = vrcp.f32 %v381_v46 }
  0xb0   : > { %v365_v35 = vpop.eup %364 }
  0xb1   : > { %v210_v36 = vmul.f32 %v365_v35, %v208_v34  ;;  %v367_v47 = vpop.eup %366 }
  0xb2   : > { %v226_v48 = vmul.f32 128.0, %v367_v47  ;;  %vm230_vm3 = vweird.f32 %v367_v47 }
  0xb3   : > { %v211_v37 = vmul.f32 %v365_v35, %v210_v36 }
  0xb4   : > { %v227_v49 = vsub.f32 1.0, %v226_v48 }
  0xb5   : > { %v212_v38 = vmul.f32 0.5, %v211_v37 }
  0xb6   : > { %v228_v50 = vmul.f32 %v367_v47, %v227_v49 }
  0xb7   : > { %v213_v39 = vsub.f32 1.5, %v212_v38 }
  0xb8   : > { %v229_v51 = vadd.f32 %v367_v47, %v228_v50 }
  0xb9   : > { %v214_v40 = vmul.f32 %v365_v35, %v213_v39 }
  0xba   : > { %v231_v52 = vsel %vm230_vm3, %v367_v47, %v229_v51 }
  0xbb   : > { %v215_v41 = vmul.f32 %v214_v40, %v208_v34 }
  0xbd   : > { %v217_v43 = vsel %vm216_vm0, %v208_v34, %v215_v41 }
  0xbe   : > { %v220_v44 = vsel %vm218_vm2, %v219_v42, %v217_v43 }
  0xbf   : > { %v222_v45 = vsel %vm221_vm1, %v220_v44, 0.0 }
  0xc0   : > { %223 = vadd.xlane.f32.xlu1 %v222_v45 }
 0x133   : > { %v224_v53 = vpop.xlane.xlu1 %223 }
 0x134   : > { %v232_v54 = vmul.f32 %v231_v52, %v224_v53 }
 0x136   : > { %v233_v55 = vadd.f32 1e-06, %v232_v54 }
 0x138   : > { %368 = vrcp.f32 %v233_v55  ;;  %v245_v59 = vand.u32 2147483648, %v233_v55  ;;  %v243_v61 = vand.u32 2147483647, %v233_v55  ;;  %vm239_vm5 = vweird.f32 %v233_v55 }
 0x13a   : > { %v246_v63 = vor.u32 1.1754944e-38, %v245_v59  ;;  %vm244_vm7 = vcmp.eq.f32.partialorder %v243_v61, 8.507059e+37 }
 0x13e   : > { %v369_v56 = vpop.eup %368 }
 0x13f   : > { %v235_v57 = vmul.f32 %v369_v56, %v233_v55  ;;  %vm240_vm4 = vweird.f32 %v369_v56 }
 0x140   : > { %vm241_vm6 = vmor %vm239_vm5, %vm240_vm4 }
 0x141   : > { %v236_v58 = vsub.f32 1.0, %v235_v57 }
 0x143   : > { %v237_v60 = vmul.f32 %v369_v56, %v236_v58 }
 0x145   : > { %v238_v62 = vadd.f32 %v369_v56, %v237_v60 }
 0x147   : > { %v242_v4 = vsel %vm241_vm6, %v369_v56, %v238_v62 }
 0x148   : > { %v247_v6 = vsel %vm244_vm7, %v246_v63, %v242_v4 }
 0x149   : > { %v248_v8 = vmul.f32 %v247_v6, %v220_v44 }
 0x14b   : > { %v250_v9 = vmul.f32 %v249_v5, %v248_v8 }
 0x14d   : > { %v251_v11 = vadd.f32 1.0, %v250_v9 }
 0x14f   : > { %v253_v14 = vperm.slane %v251_v11, 0 }
 0x151   : > { %v255_v15 = vmul.f32 %v253_v14, %v418_v0  ;;  %v256_v17 = vmul.f32 %v253_v14, %v420_v1  ;;  %v257_v18 = vmul.f32 %v253_v14, %v422_v2  ;;  %v258_v19 = vmul.f32 %v253_v14, %v424_v3 }
 0x152   : > { %v259_v20 = vmul.f32 %v253_v14, %v432_v7  ;;  %v260_v21 = vmul.f32 %v253_v14, %v436_v10  ;;  %v261_v22 = vmul.f32 %v253_v14, %v440_v13  ;;  %v262_v1 = vmul.f32 %v253_v14, %v444_v16 }
 0x153   : > { %v267_v23 = vadd.f32 %v363_v12, %v255_v15  ;;  %v268_v24 = vadd.f32 %v363_v12, %v256_v17  ;;  %v269_v0 = vadd.f32 %v363_v12, %v257_v18  ;;  %v270_v25 = vadd.f32 %v363_v12, %v258_v19 }
 0x154   : > { %v271_v2 = vadd.f32 %v363_v12, %v259_v20  ;;  %v272_v3 = vadd.f32 %v363_v12, %v260_v21  ;;  %v273_v26 = vadd.f32 %v363_v12, %v261_v22  ;;  %v274_v27 = vadd.f32 %v363_v12, %v262_v1 }
 0x155   : > { %275 = vst [vmem:[%s170_s27] sm:$0xff] %v267_v23 }
 0x156   : > { %276 = vst [vmem:[%s170_s27 + $0x8] sm:$0xff] %v268_v24 }
 0x157   : > { %277 = vst [vmem:[%s170_s27 + $0x10] sm:$0xff] %v269_v0 }
 0x158   : > { %278 = vst [vmem:[%s170_s27 + $0x18] sm:$0xff] %v270_v25 }
 0x159   : > { %279 = vst [vmem:[%s170_s27 + $0x20] sm:$0xff] %v271_v2 }
 0x15a   : > { %280 = vst [vmem:[%s170_s27 + $0x28] sm:$0xff] %v272_v3 }
 0x15b   : > { %281 = vst [vmem:[%s170_s27 + $0x30] sm:$0xff] %v273_v26 }
 0x15c   : > { %282 = vst [vmem:[%s170_s27 + $0x38] sm:$0xff] %v274_v27 }
 0x15d PF: > { %s13_s12 = sadd.s32 1, %s376_s12  }
 0x15e   : > { %p10_p4 = scmp.ge.s32.totalorder %s13_s12, 4  }
 0x160   :  { %12 = sbr.rel (!%p10_p4) target bundleno = 1 (0x1), region = 62 }

</bundles_post_ra>
